<compile_context>
chip_gen: v6e
topology: v6e:2x2x1
jax: 0.10.0
libtpu: 0.0.40
codegen_flags: <defaults>
</compile_context>

<pallas_src>
import functools
import math

import jax
import jax.numpy as jnp
import numpy as np
from jax.experimental import pallas as pl
from jax.experimental.pallas import tpu as pltpu


def _device_kind():
    try:
        return jax.devices()[0].device_kind.lower()
    except Exception:
        return ""


def _is_v7x():
    return "v7" in _device_kind()


def _num_tensorcores():
    # v7x has 2 TensorCores per chip worth splitting over; v5e / v6e have 1
    # (splitting there would only add a pointless second partial-sum pass).
    return 2 if _is_v7x() else 1


def _masked_l2_kernel(out_ref, tgt_ref, msk_ref,     # inputs, (tile_r, L)
                      esum_ref, msum_ref,            # outputs, (1, L) per core
                      eacc, macc,                    # VMEM scratch, (tile_r, L)
                      *, n_rows, tile_r, lane_w, steps_per_core,
                      needs_row_mask):
    c = pl.program_id(0)
    i = pl.program_id(1)

    @pl.when(i == 0)
    def _():
        eacc[...] = jnp.zeros_like(eacc)
        macc[...] = jnp.zeros_like(macc)

    o = out_ref[...].astype(jnp.float32)
    t = tgt_ref[...].astype(jnp.float32)
    m = msk_ref[...].astype(jnp.float32)

    d = o - t
    e = d * d * m

    if needs_row_mask:
        # Rows at/past n_rows belong to a ragged or redundant (clamped) block:
        # their buffer contents are stale, so select them to exactly zero
        # (where-select, NaN-safe).  Static Python flag => no cost otherwise.
        row0 = (c * steps_per_core + i) * tile_r
        rows = row0 + jax.lax.broadcasted_iota(jnp.int32, (tile_r, lane_w), 0)
        valid = rows < n_rows
        e = jnp.where(valid, e, 0.0)
        m = jnp.where(valid, m, 0.0)

    # Pure elementwise (VPU) accumulation -- no per-iteration reduce.
    eacc[...] = eacc[...] + e
    macc[...] = macc[...] + m

    @pl.when(i == pl.num_programs(1) - 1)
    def _():
        # Single cross-sublane (XLU) reduce, once per core at the very end.
        # Lane j of the result is the partial sum for feature j % F.
        esum_ref[...] = jnp.sum(eacc[...], axis=0, keepdims=True)
        msum_ref[...] = jnp.sum(macc[...], axis=0, keepdims=True)


def masked_l2_v2(output, target, mask, *, tile_r=None, n_cores=None,
                 core_parallel=None):
    """output / target / mask: [N, F] (any float / int dtype).
    Returns the same dict of loss terms as PyTorch MaskedL2V2.forward."""
    N, F = output.shape
    assert target.shape == (N, F) and mask.shape == (N, F)
    # TODO(synk): for F > 128 the wrapper-side per-feature fold would need a
    # second level of tiling; the legacy module uses F == 6.
    assert F <= 128

    T = N * F
    L = (F * 128) // math.gcd(F, 128)        # lcm(F, 128); 384 for F == 6
    R = pl.cdiv(T, L)                        # rows of the flat (R, L) view

    # Block rows: large enough to amortize the ~0.35us/step overhead
    # (~1.5 MiB of f32 per input per step at 1024 x 384), multiple of 8
    # (sublanes) unless the whole array fits in a single block.
    if tile_r is None:
        tile_r = 1024
    tile_r = min(tile_r, R)
    if tile_r < R:
        tile_r = max(8, (tile_r // 8) * 8)

    n_blocks = pl.cdiv(R, tile_r)

    if n_cores is None:
        n_cores = _num_tensorcores()
    n_cores = max(1, min(n_cores, n_blocks))
    steps_per_core = pl.cdiv(n_blocks, n_cores)

    Tp = R * L

    def _flat(x):
        xf = jnp.reshape(x, (T,))
        if Tp != T:
            # Only the < L-element ragged tail of the flat array is padded
            # (zero contributes 0 to both sums).  When N*F % L == 0 this is a
            # zero-copy reshape.
            xf = jnp.pad(xf, (0, Tp - T))
        return jnp.reshape(xf, (R, L))

    outF, tgtF, mskF = _flat(output), _flat(target), _flat(mask)

    needs_row_mask = (R % tile_r != 0) or (n_blocks % n_cores != 0)

    if n_blocks % n_cores == 0:
        def in_idx(c, i):
            return (c * steps_per_core + i, 0)
    else:
        def in_idx(c, i):
            # Redundant trailing steps of the last core re-read the final
            # block (kept in-bounds); the in-kernel row mask zeroes them.
            return (jnp.minimum(c * steps_per_core + i, n_blocks - 1), 0)

    in_spec = pl.BlockSpec((tile_r, L), in_idx)
    out_spec = pl.BlockSpec((None, 1, L), lambda c, i: (c, 0, 0))

    kernel = functools.partial(
        _masked_l2_kernel, n_rows=R, tile_r=tile_r, lane_w=L,
        steps_per_core=steps_per_core, needs_row_mask=needs_row_mask)

    # Guaranteed 2-TC split on v7x; plain "parallel" elsewhere (harmless on
    # single-TC chips, and the path previously validated on the sandbox).
    if core_parallel is None:
        core_parallel = n_cores > 1 and _is_v7x()
    if core_parallel:
        dims = (pltpu.CORE_PARALLEL, pltpu.ARBITRARY)
    else:
        dims = ("parallel", "arbitrary")

    esum_p, msum_p = pl.pallas_call(
        kernel,
        out_shape=(jax.ShapeDtypeStruct((n_cores, 1, L), jnp.float32),
                   jax.ShapeDtypeStruct((n_cores, 1, L), jnp.float32)),
        grid_spec=pltpu.PrefetchScalarGridSpec(
            num_scalar_prefetch=0,
            grid=(n_cores, steps_per_core),
            in_specs=[in_spec, in_spec, in_spec],
            out_specs=[out_spec, out_spec],
            scratch_shapes=[pltpu.VMEM((tile_r, L), jnp.float32),
                            pltpu.VMEM((tile_r, L), jnp.float32)]),
        compiler_params=pltpu.CompilerParams(
            dimension_semantics=dims,
            vmem_limit_bytes=32 * 1024 * 1024),
    )(outF, tgtF, mskF)

    # Tiny O(n_cores * L) final combine in plain JAX: fold lanes (feature of
    # lane j is j % F) and cores, then mirror the PyTorch forward.
    esum = jnp.sum(esum_p[:, 0, :].reshape(n_cores, L // F, F), axis=(0, 1))
    msum = jnp.sum(msum_p[:, 0, :].reshape(n_cores, L // F, F), axis=(0, 1))
    msum_c = jnp.maximum(msum, 1e-6)
    err = esum / msum_c
    total = jnp.sum(err * msum_c) / jnp.maximum(jnp.sum(msum), 1e-6)
    return {
        'total': total,
        'balanced total': jnp.mean(err),
        'vm': err[0],
        'va': err[1],
        'p': err[2],
        'q': err[3],
    }


def _reference(output, target, mask):
    """Pure-JAX reference matching the PyTorch forward."""
    output = output.astype(jnp.float32)
    target = target.astype(jnp.float32)
    mask = mask.astype(jnp.float32)
    error = (output - target) ** 2
    msum = mask.sum(axis=0)
    msum_c = jnp.maximum(msum, 1e-6)
    err = (error * mask).sum(axis=0) / msum_c
    return {
        'total': (err * msum_c).sum() / jnp.maximum(mask.sum(), 1e-6),
        'balanced total': err.mean(),
        'vm': err[0],
        'va': err[1],
        'p': err[2],
        'q': err[3],
    }


if __name__ == "__main__":
    key = jax.random.PRNGKey(0)
    k1, k2, k3, k4, k5, k6 = jax.random.split(key, 6)

    # Primary small case matching the legacy module: [N, F] with F == 6.
    N, F = 16, 6
    output = jax.random.normal(k1, (N, F), dtype=jnp.float32)
    target = jax.random.normal(k2, (N, F), dtype=jnp.float32)
    mask = (jax.random.uniform(k3, (N, F)) > 0.3).astype(jnp.float32)

    loss_fn = jax.jit(masked_l2_v2)
    loss_terms = loss_fn(output, target, mask)
    loss_terms = jax.tree_util.tree_map(jax.block_until_ready, loss_terms)
    ref = _reference(output, target, mask)
    for k in loss_terms:
        np.testing.assert_allclose(np.asarray(loss_terms[k]),
                                   np.asarray(ref[k]), rtol=1e-5, atol=1e-6)

    # Secondary case: ragged N, bf16 inputs (halved HBM traffic), small tiles
    # forced so the multi-step / multi-block / clamped-tail code paths run.
    N2 = 2200
    out2 = jax.random.normal(k4, (N2, F), dtype=jnp.float32).astype(jnp.bfloat16)
    tgt2 = jax.random.normal(k5, (N2, F), dtype=jnp.float32).astype(jnp.bfloat16)
    msk2 = (jax.random.uniform(k6, (N2, F)) > 0.3).astype(jnp.bfloat16)

    loss_fn2 = jax.jit(functools.partial(masked_l2_v2, tile_r=8, n_cores=2))
    lt2 = loss_fn2(out2, tgt2, msk2)
    lt2 = jax.tree_util.tree_map(jax.block_until_ready, lt2)
    ref2 = _reference(out2, tgt2, msk2)
    for k in lt2:
        np.testing.assert_allclose(np.asarray(lt2[k]),
                                   np.asarray(ref2[k]), rtol=5e-4, atol=5e-5)

    print("KERNEL_OK")
</pallas_src>

<mosaic_0001>
module attributes {stable_mosaic.version = 11 : i64} {
  func.func @_masked_l2_kernel(%arg0: i32, %arg1: i32, %arg2: memref<1x384xf32, #tpu.memory_space<vmem>>, %arg3: memref<1x384xf32, #tpu.memory_space<vmem>>, %arg4: memref<1x384xf32, #tpu.memory_space<vmem>>, %arg5: memref<1x1x384xf32, #tpu.memory_space<vmem>>, %arg6: memref<1x1x384xf32, #tpu.memory_space<vmem>>, %arg7: memref<1x384xf32, #tpu.memory_space<vmem>>, %arg8: memref<1x384xf32, #tpu.memory_space<vmem>>) attributes {dimension_semantics = [#tpu.dimension_semantics<parallel>, #tpu.dimension_semantics<arbitrary>], iteration_bounds = array<i64: 1, 1>, scalar_prefetch = 0 : i64, scratch_operands = 2 : i64, tpu.core_type = #tpu.core_type<tc>, window_params = [{transform_indices = @transform_0, window_bounds = array<i64: 1, 384>}, {transform_indices = @transform_1, window_bounds = array<i64: 1, 384>}, {transform_indices = @transform_2, window_bounds = array<i64: 1, 384>}, {transform_indices = @transform_3, window_bounds = array<i64: 1, 1, 384>}, {transform_indices = @transform_4, window_bounds = array<i64: 1, 1, 384>}]} {
    %c0_i32 = arith.constant 0 : i32
    %0 = arith.cmpi eq, %arg1, %c0_i32 : i32
    %1 = arith.extui %0 : i1 to i32
    %c0_i32_0 = arith.constant 0 : i32
    %2 = arith.cmpi ne, %1, %c0_i32_0 : i32
    scf.if %2 {
      %cst = arith.constant 0.000000e+00 : f32
      %18 = vector.broadcast %cst : f32 to vector<1x384xf32>
      %c0_16 = arith.constant 0 : index
      %c0_17 = arith.constant 0 : index
      %19 = vector.load %arg7[%c0_16, %c0_17] : memref<1x384xf32, #tpu.memory_space<vmem>>, vector<1x384xf32>
      tpu.vector_store %arg7[%c0_16, %c0_17], %18 {strides = array<i32>} : memref<1x384xf32, #tpu.memory_space<vmem>>, vector<1x384xf32>,
      %cst_18 = arith.constant 0.000000e+00 : f32
      %20 = vector.broadcast %cst_18 : f32 to vector<1x384xf32>
      %c0_19 = arith.constant 0 : index
      %c0_20 = arith.constant 0 : index
      %21 = vector.load %arg8[%c0_19, %c0_20] : memref<1x384xf32, #tpu.memory_space<vmem>>, vector<1x384xf32>
      tpu.vector_store %arg8[%c0_19, %c0_20], %20 {strides = array<i32>} : memref<1x384xf32, #tpu.memory_space<vmem>>, vector<1x384xf32>,
    } else {
    }
    %c0 = arith.constant 0 : index
    %c0_1 = arith.constant 0 : index
    %3 = vector.load %arg2[%c0, %c0_1] : memref<1x384xf32, #tpu.memory_space<vmem>>, vector<1x384xf32>
    %c0_2 = arith.constant 0 : index
    %c0_3 = arith.constant 0 : index
    %4 = vector.load %arg3[%c0_2, %c0_3] : memref<1x384xf32, #tpu.memory_space<vmem>>, vector<1x384xf32>
    %c0_4 = arith.constant 0 : index
    %c0_5 = arith.constant 0 : index
    %5 = vector.load %arg4[%c0_4, %c0_5] : memref<1x384xf32, #tpu.memory_space<vmem>>, vector<1x384xf32>
    %6 = arith.subf %3, %4 : vector<1x384xf32>
    %7 = arith.mulf %6, %6 : vector<1x384xf32>
    %8 = arith.mulf %7, %5 : vector<1x384xf32>
    %c0_6 = arith.constant 0 : index
    %c0_7 = arith.constant 0 : index
    %9 = vector.load %arg7[%c0_6, %c0_7] : memref<1x384xf32, #tpu.memory_space<vmem>>, vector<1x384xf32>
    %10 = arith.addf %9, %8 : vector<1x384xf32>
    %c0_8 = arith.constant 0 : index
    %c0_9 = arith.constant 0 : index
    %11 = vector.load %arg7[%c0_8, %c0_9] : memref<1x384xf32, #tpu.memory_space<vmem>>, vector<1x384xf32>
    tpu.vector_store %arg7[%c0_8, %c0_9], %10 {strides = array<i32>} : memref<1x384xf32, #tpu.memory_space<vmem>>, vector<1x384xf32>,
    %c0_10 = arith.constant 0 : index
    %c0_11 = arith.constant 0 : index
    %12 = vector.load %arg8[%c0_10, %c0_11] : memref<1x384xf32, #tpu.memory_space<vmem>>, vector<1x384xf32>
    %13 = arith.addf %12, %5 : vector<1x384xf32>
    %c0_12 = arith.constant 0 : index
    %c0_13 = arith.constant 0 : index
    %14 = vector.load %arg8[%c0_12, %c0_13] : memref<1x384xf32, #tpu.memory_space<vmem>>, vector<1x384xf32>
    tpu.vector_store %arg8[%c0_12, %c0_13], %13 {strides = array<i32>} : memref<1x384xf32, #tpu.memory_space<vmem>>, vector<1x384xf32>,
    %c0_i32_14 = arith.constant 0 : i32
    %15 = arith.cmpi eq, %arg1, %c0_i32_14 : i32
    %16 = arith.extui %15 : i1 to i32
    %c0_i32_15 = arith.constant 0 : i32
    %17 = arith.cmpi ne, %16, %c0_i32_15 : i32
    scf.if %17 {
      %c0_16 = arith.constant 0 : index
      %c0_17 = arith.constant 0 : index
      %18 = vector.load %arg7[%c0_16, %c0_17] : memref<1x384xf32, #tpu.memory_space<vmem>>, vector<1x384xf32>
      %cst = arith.constant dense<0.000000e+00> : vector<384xf32>
      %19 = vector.multi_reduction <add>, %18, %cst [0] : vector<1x384xf32> to vector<384xf32>
      %20 = vector.shape_cast %19 : vector<384xf32> to vector<1x384xf32>
      %c0_18 = arith.constant 0 : index
      %c0_19 = arith.constant 0 : index
      %c0_20 = arith.constant 0 : index
      %21 = vector.load %arg5[%c0_18, %c0_19, %c0_20] : memref<1x1x384xf32, #tpu.memory_space<vmem>>, vector<1x1x384xf32>
      %22 = vector.shape_cast %21 : vector<1x1x384xf32> to vector<1x384xf32>
      %23 = vector.shape_cast %20 : vector<1x384xf32> to vector<1x1x384xf32>
      tpu.vector_store %arg5[%c0_18, %c0_19, %c0_20], %23 {strides = array<i32>} : memref<1x1x384xf32, #tpu.memory_space<vmem>>, vector<1x1x384xf32>,
      %c0_21 = arith.constant 0 : index
      %c0_22 = arith.constant 0 : index
      %24 = vector.load %arg8[%c0_21, %c0_22] : memref<1x384xf32, #tpu.memory_space<vmem>>, vector<1x384xf32>
      %cst_23 = arith.constant dense<0.000000e+00> : vector<384xf32>
      %25 = vector.multi_reduction <add>, %24, %cst_23 [0] : vector<1x384xf32> to vector<384xf32>
      %26 = vector.shape_cast %25 : vector<384xf32> to vector<1x384xf32>
      %c0_24 = arith.constant 0 : index
      %c0_25 = arith.constant 0 : index
      %c0_26 = arith.constant 0 : index
      %27 = vector.load %arg6[%c0_24, %c0_25, %c0_26] : memref<1x1x384xf32, #tpu.memory_space<vmem>>, vector<1x1x384xf32>
      %28 = vector.shape_cast %27 : vector<1x1x384xf32> to vector<1x384xf32>
      %29 = vector.shape_cast %26 : vector<1x384xf32> to vector<1x1x384xf32>
      tpu.vector_store %arg6[%c0_24, %c0_25, %c0_26], %29 {strides = array<i32>} : memref<1x1x384xf32, #tpu.memory_space<vmem>>, vector<1x1x384xf32>,
    } else {
    }
    return
  }
  func.func @transform_0(%arg0: i32, %arg1: i32) -> (i32, i32) {
    %c1_i32 = arith.constant 1 : i32
    %0 = arith.muli %arg0, %c1_i32 : i32
    %1 = arith.addi %0, %arg1 : i32
    %c0_i32 = arith.constant 0 : i32
    %c0_i32_0 = arith.constant 0 : i32
    return %1, %c0_i32 : i32, i32
  }
  func.func @transform_1(%arg0: i32, %arg1: i32) -> (i32, i32) {
    %c1_i32 = arith.constant 1 : i32
    %0 = arith.muli %arg0, %c1_i32 : i32
    %1 = arith.addi %0, %arg1 : i32
    %c0_i32 = arith.constant 0 : i32
    %c0_i32_0 = arith.constant 0 : i32
    return %1, %c0_i32 : i32, i32
  }
  func.func @transform_2(%arg0: i32, %arg1: i32) -> (i32, i32) {
    %c1_i32 = arith.constant 1 : i32
    %0 = arith.muli %arg0, %c1_i32 : i32
    %1 = arith.addi %0, %arg1 : i32
    %c0_i32 = arith.constant 0 : i32
    %c0_i32_0 = arith.constant 0 : i32
    return %1, %c0_i32 : i32, i32
  }
  func.func @transform_3(%arg0: i32, %arg1: i32) -> (i32, i32, i32) {
    %c0_i32 = arith.constant 0 : i32
    %c0_i32_0 = arith.constant 0 : i32
    %c0_i32_1 = arith.constant 0 : i32
    return %arg0, %c0_i32, %c0_i32_0 : i32, i32, i32
  }
  func.func @transform_4(%arg0: i32, %arg1: i32) -> (i32, i32, i32) {
    %c0_i32 = arith.constant 0 : i32
    %c0_i32_0 = arith.constant 0 : i32
    %c0_i32_1 = arith.constant 0 : i32
    return %arg0, %c0_i32, %c0_i32_0 : i32, i32, i32
  }
}

</mosaic_0001>

<bundles_post_ra>
// kernel: squeeze.7
= control target key start
LH: loop header
LB: loop body
LE: loop exit
PB: predicated region body
PF: predicated region fallthrough
CT: control target
= control target key end

     0   :  { %s573_s8 = smov 122   ;;  %s574_s9 = smov 124   ;;  %vm421_vm0 = vcmask 1014784   ;;  %vm434_vm1 = vcmask 1031168   ;;  %vm8_vm2 = vcmask 48128   ;;  %vm425_vm3 = vcmask 31744   ;;  %s908_s0 = inlined_call_operand.vmem [shape: f32[384], index: 0, kind: input, shape index: {}]   ;;  %s909_s1 = inlined_call_operand.vmem [shape: f32[64,6], index: 1, kind: output, shape index: {}]  }
   0x1   :  { %v5_v0 = vld [vmem:[%s908_s0] sm:$0xf]  ;;  %s572_s0 = smov 126   ;;  %s575_s10 = smov 120   ;;  %vm438_vm4 = vcmask 15360   ;;  %vm428_vm5 = vcmask 48160  }
   0x2   :  { %6 = vst [vmem:[#allocation0] sm:$0xf] %v5_v0  ;;  %s576_s11 = smov 118   ;;  %s577_s12 = smov 116   ;;  %vm441_vm6 = vcmask 48144  }
   0x3   :  { %s578_s13 = smov 114   ;;  %s579_s14 = smov 112  }
   0x4   :  { %s580_s15 = smov 110   ;;  %s581_s16 = smov 108  }
   0x5   :  { %s582_s17 = smov 106   ;;  %s583_s18 = smov 104  }
   0x6   :  { %s584_s19 = smov 102   ;;  %s585_s20 = smov 100  }
   0x7   :  { %s586_s21 = smov 98   ;;  %s587_s22 = smov 96  }
   0x8   :  { %s588_s23 = smov 94   ;;  %s589_s24 = smov 92  }
   0x9   :  { %v11_v1 = vld [vmem:[#allocation0 + $0x2] sm:$0x1]   ;;  %v24_v2 = vld [vmem:[#allocation0] sm:$0x1]   ;;  %v18_v3 = vld [vmem:[#allocation0 + $0x1] sm:$0x1]  }
   0xa   :  { %12 = vrot.lane.b32.xlu0 %v11_v1, %s572_s0  ;;  %25 = vrot.lane.b32.xlu1 %v24_v2, %s573_s8  ;;  %v31_v4 = vld [vmem:[#allocation0 + $0x2] sm:$0x1]   ;;  %v38_v5 = vld [vmem:[#allocation0 + $0x1] sm:$0x1]   ;;  %v44_v6 = vld [vmem:[#allocation0] sm:$0x1]  }
   0xb   :  { %v51_v7 = vld [vmem:[#allocation0 + $0x2] sm:$0x1]   ;;  %v58_v8 = vld [vmem:[#allocation0 + $0x1] sm:$0x1]   ;;  %v64_v9 = vld [vmem:[#allocation0] sm:$0x1]  }
   0xc   :  { %v71_v10 = vld [vmem:[#allocation0 + $0x2] sm:$0x1]   ;;  %v78_v11 = vld [vmem:[#allocation0 + $0x1] sm:$0x1]   ;;  %v84_v12 = vld [vmem:[#allocation0] sm:$0x1]  }
   0xd   :  { %v91_v13 = vld [vmem:[#allocation0 + $0x2] sm:$0x1]   ;;  %v98_v14 = vld [vmem:[#allocation0 + $0x1] sm:$0x1]   ;;  %v104_v15 = vld [vmem:[#allocation0] sm:$0x1]  }
   0xe   :  { %19 = vrot.lane.b32.xlu0 %v18_v3, %s574_s9  ;;  %32 = vrot.lane.b32.xlu1 %v31_v4, %s575_s10  ;;  %v111_v16 = vld [vmem:[#allocation0 + $0x2] sm:$0x1]   ;;  %v118_v17 = vld [vmem:[#allocation0 + $0x1] sm:$0x1]   ;;  %v124_v18 = vld [vmem:[#allocation0] sm:$0x1]  }
   0xf   :  { %v131_v19 = vld [vmem:[#allocation0 + $0x2] sm:$0x1]   ;;  %v138_v20 = vld [vmem:[#allocation0 + $0x1] sm:$0x1]   ;;  %s590_s25 = smov 90   ;;  %s591_s26 = smov 88  }
  0x10   :  { %v144_v21 = vld [vmem:[#allocation0] sm:$0x1]   ;;  %v151_v22 = vld [vmem:[#allocation0 + $0x2] sm:$0x1]   ;;  %s592_s27 = smov 86   ;;  %s593_s28 = smov 84  }
  0x11   :  { %v158_v23 = vld [vmem:[#allocation0 + $0x1] sm:$0x1]   ;;  %v164_v24 = vld [vmem:[#allocation0] sm:$0x1]   ;;  %s594_s29 = smov 82   ;;  %s595_s30 = smov 80  }
  0x12   :  { %39 = vrot.lane.b32.xlu0 %v38_v5, %s576_s11  ;;  %45 = vrot.lane.b32.xlu1 %v44_v6, %s577_s12  ;;  %v171_v25 = vld [vmem:[#allocation0 + $0x2] sm:$0x1]   ;;  %v178_v26 = vld [vmem:[#allocation0 + $0x1] sm:$0x1]   ;;  %s596_s2 = smov 78   ;;  %s597_s3 = smov 76  }
  0x13   :  { %v184_v27 = vld [vmem:[#allocation0] sm:$0x1]   ;;  %v191_v28 = vld [vmem:[#allocation0 + $0x2] sm:$0x1]   ;;  %s598_s4 = smov 74   ;;  %s599_s5 = smov 72  }
  0x14   :  { %v198_v29 = vld [vmem:[#allocation0 + $0x1] sm:$0x1]   ;;  %v204_v30 = vld [vmem:[#allocation0] sm:$0x1]   ;;  %s600_s6 = smov 70   ;;  %s601_s7 = smov 68  }
  0x15   :  { %v211_v31 = vld [vmem:[#allocation0 + $0x2] sm:$0x1]   ;;  %v218_v32 = vld [vmem:[#allocation0 + $0x1] sm:$0x1]   ;;  %s602_s0 = smov 66   ;;  %s603_s8 = smov 64  }
  0x16   :  { %52 = vrot.lane.b32.xlu0 %v51_v7, %s578_s13  ;;  %59 = vrot.lane.b32.xlu1 %v58_v8, %s579_s14  ;;  %v224_v33 = vld [vmem:[#allocation0] sm:$0x1]   ;;  %v231_v34 = vld [vmem:[#allocation0 + $0x2] sm:$0x1]   ;;  %v418_v35 = vld [vmem:[#allocation0 + $0x1] sm:$0x1]  }
  0x17   :  { %v420_v36 = vld [vmem:[#allocation0 + $0x2] sm:$0x1]   ;;  %v431_v37 = vld [vmem:[#allocation0] sm:$0x1]   ;;  %v433_v38 = vld [vmem:[#allocation0 + $0x1] sm:$0x1]  }
  0x18   :  { %s604_s9 = smov 62   ;;  %s605_s10 = smov 60   ;;  %v422_v39 = vsel %vm421_vm0, %v420_v36, %v418_v35  ;;  %v435_v40 = vsel %vm434_vm1, %v433_v38, %v431_v37  ;;  %v238_v41 = vld [vmem:[#allocation0 + $0x1] sm:$0x1]   ;;  %v244_v42 = vld [vmem:[#allocation0] sm:$0x1]  }
  0x19   :  { %s606_s11 = smov 4   ;;  %s607_s12 = smov 2   ;;  %v251_v43 = vld [vmem:[#allocation0 + $0x2] sm:$0x1]   ;;  %v258_v44 = vld [vmem:[#allocation0 + $0x1] sm:$0x1]  }
  0x1a   :  { %65 = vrot.lane.b32.xlu0 %v64_v9, %s580_s15  ;;  %72 = vrot.lane.b32.xlu1 %v71_v10, %s581_s16  ;;  %s608_s13 = smov 58   ;;  %s609_s14 = smov 56   ;;  %v264_v45 = vld [vmem:[#allocation0] sm:$0x1]   ;;  %v271_v46 = vld [vmem:[#allocation0 + $0x2] sm:$0x1]  }
  0x1b   :  { %s610_s15 = smov 54   ;;  %s611_s16 = smov 52   ;;  %v278_v47 = vld [vmem:[#allocation0 + $0x1] sm:$0x1]   ;;  %v284_v48 = vld [vmem:[#allocation0] sm:$0x1]  }
  0x1c   :  { %v291_v49 = vld [vmem:[#allocation0 + $0x2] sm:$0x1]   ;;  %v298_v50 = vld [vmem:[#allocation0 + $0x1] sm:$0x1]   ;;  %v304_v51 = vld [vmem:[#allocation0] sm:$0x1]  }
  0x1d   :  { %v311_v52 = vld [vmem:[#allocation0 + $0x2] sm:$0x1]   ;;  %v318_v53 = vld [vmem:[#allocation0 + $0x1] sm:$0x1]   ;;  %v324_v54 = vld [vmem:[#allocation0] sm:$0x1]  }
  0x1e   :  { %79 = vrot.lane.b32.xlu0 %v78_v11, %s582_s17  ;;  %85 = vrot.lane.b32.xlu1 %v84_v12, %s583_s18  ;;  %s612_s17 = smov 50   ;;  %s613_s18 = smov 48   ;;  %v331_v55 = vld [vmem:[#allocation0 + $0x2] sm:$0x1]   ;;  %v338_v56 = vld [vmem:[#allocation0 + $0x1] sm:$0x1]  }
  0x1f   :  { %v344_v57 = vld [vmem:[#allocation0] sm:$0x1]   ;;  %v351_v58 = vld [vmem:[#allocation0 + $0x2] sm:$0x1]   ;;  %v358_v59 = vld [vmem:[#allocation0 + $0x1] sm:$0x1]  }
  0x20   :  { %v364_v60 = vld [vmem:[#allocation0] sm:$0x1]   ;;  %v371_v61 = vld [vmem:[#allocation0 + $0x2] sm:$0x1]   ;;  %v378_v62 = vld [vmem:[#allocation0 + $0x1] sm:$0x1]  }
  0x21   :  { %v7_v63 = vld [vmem:[#allocation0] sm:$0x1]   ;;  %v391_v1 = vld [vmem:[#allocation0 + $0x2] sm:$0x1]   ;;  %v398_v4 = vld [vmem:[#allocation0 + $0x1] sm:$0x1]  }
  0x22   :  { %92 = vrot.lane.b32.xlu0 %v91_v13, %s584_s19  ;;  %99 = vrot.lane.b32.xlu1 %v98_v14, %s585_s20  ;;  %s614_s19 = smov 46   ;;  %s615_s20 = smov 44   ;;  %9 = vst.msk [vmem:[%s909_s1] sm:$0x1] %vm8_vm2, %v7_v63   ;;  %v384_v0 = vld [vmem:[#allocation0] sm:$0x1]  }
  0x23   :  { %v404_v5 = vld [vmem:[#allocation0] sm:$0x1]   ;;  %v411_v8 = vld [vmem:[#allocation0 + $0x2] sm:$0x1]  }
  0x26   :  { %105 = vrot.lane.b32.xlu0 %v104_v15, %s586_s21  ;;  %112 = vrot.lane.b32.xlu1 %v111_v16, %s587_s22  ;;  %s616_s21 = smov 42   ;;  %s617_s22 = smov 40  }
  0x2a   :  { %119 = vrot.lane.b32.xlu0 %v118_v17, %s588_s23  ;;  %125 = vrot.lane.b32.xlu1 %v124_v18, %s589_s24  ;;  %s618_s23 = smov 38   ;;  %s619_s24 = smov 36  }
  0x2e   :  { %132 = vrot.lane.b32.xlu0 %v131_v19, %s590_s25  ;;  %139 = vrot.lane.b32.xlu1 %v138_v20, %s591_s26  ;;  %s620_s25 = smov 34   ;;  %s621_s26 = smov 32  }
  0x32   :  { %145 = vrot.lane.b32.xlu0 %v144_v21, %s592_s27  ;;  %152 = vrot.lane.b32.xlu1 %v151_v22, %s593_s28  ;;  %s622_s27 = smov 30   ;;  %s623_s28 = smov 28  }
  0x36   :  { %159 = vrot.lane.b32.xlu0 %v158_v23, %s594_s29  ;;  %165 = vrot.lane.b32.xlu1 %v164_v24, %s595_s30  ;;  %s624_s29 = smov 26   ;;  %s625_s30 = smov 24  }
  0x3a   :  { %172 = vrot.lane.b32.xlu0 %v171_v25, %s596_s2  ;;  %179 = vrot.lane.b32.xlu1 %v178_v26, %s597_s3  ;;  %s626_s2 = smov 22   ;;  %s627_s3 = smov 20  }
  0x3e   :  { %185 = vrot.lane.b32.xlu0 %v184_v27, %s598_s4  ;;  %192 = vrot.lane.b32.xlu1 %v191_v28, %s599_s5 }
  0x42   :  { %199 = vrot.lane.b32.xlu0 %v198_v29, %s600_s6  ;;  %205 = vrot.lane.b32.xlu1 %v204_v30, %s601_s7  ;;  %s628_s6 = smov 18   ;;  %s629_s7 = smov 16  }
  0x46   :  { %212 = vrot.lane.b32.xlu0 %v211_v31, %s602_s0  ;;  %219 = vrot.lane.b32.xlu1 %v218_v32, %s603_s8 }
  0x4a   :  { %225 = vrot.lane.b32.xlu0 %v224_v33, %s604_s9  ;;  %232 = vrot.lane.b32.xlu1 %v231_v34, %s605_s10 }
  0x4e   :  { %423 = vrot.lane.b32.xlu0 %v422_v39, %s606_s11  ;;  %436 = vrot.lane.b32.xlu1 %v435_v40, %s607_s12  ;;  %s630_s11 = smov 14   ;;  %s631_s12 = smov 12  }
  0x52   :  { %239 = vrot.lane.b32.xlu0 %v238_v41, %s608_s13  ;;  %245 = vrot.lane.b32.xlu1 %v244_v42, %s609_s14 }
  0x56   :  { %252 = vrot.lane.b32.xlu0 %v251_v43, %s610_s15  ;;  %259 = vrot.lane.b32.xlu1 %v258_v44, %s611_s16 }
  0x5a   :  { %265 = vrot.lane.b32.xlu0 %v264_v45, %s612_s17  ;;  %272 = vrot.lane.b32.xlu1 %v271_v46, %s613_s18  ;;  %s632_s17 = smov 10   ;;  %s633_s18 = smov 8  }
  0x5e   :  { %279 = vrot.lane.b32.xlu0 %v278_v47, %s614_s19  ;;  %285 = vrot.lane.b32.xlu1 %v284_v48, %s615_s20 }
  0x62   :  { %292 = vrot.lane.b32.xlu0 %v291_v49, %s616_s21  ;;  %299 = vrot.lane.b32.xlu1 %v298_v50, %s617_s22 }
  0x66   :  { %305 = vrot.lane.b32.xlu0 %v304_v51, %s618_s23  ;;  %312 = vrot.lane.b32.xlu1 %v311_v52, %s619_s24  ;;  %s634_s23 = smov 6  }
  0x6a   :  { %319 = vrot.lane.b32.xlu0 %v318_v53, %s620_s25  ;;  %325 = vrot.lane.b32.xlu1 %v324_v54, %s621_s26 }
  0x6e   :  { %332 = vrot.lane.b32.xlu0 %v331_v55, %s622_s27  ;;  %339 = vrot.lane.b32.xlu1 %v338_v56, %s623_s28 }
  0x72   :  { %345 = vrot.lane.b32.xlu0 %v344_v57, %s624_s29  ;;  %352 = vrot.lane.b32.xlu1 %v351_v58, %s625_s30 }
  0x76   :  { %359 = vrot.lane.b32.xlu0 %v358_v59, %s626_s2  ;;  %365 = vrot.lane.b32.xlu1 %v364_v60, %s627_s3 }
  0x7a   :  { %372 = vrot.lane.b32.xlu0 %v371_v61, %s628_s6  ;;  %379 = vrot.lane.b32.xlu1 %v378_v62, %s629_s7 }
  0x7c   :  { %v13_v2 = vpop.permute.xlu0 %12   ;;  %v26_v3 = vpop.permute.xlu1 %25  }
  0x7d   :  { %444 = vst.msk [vmem:[%s909_s1 + $0x2b] sm:$0x1] %vm8_vm2, %v13_v2   ;;  %446 = vst.msk [vmem:[%s909_s1 + $0x1] sm:$0x1] %vm8_vm2, %v26_v3  }
  0x7e   :  { %385 = vrot.lane.b32.xlu0 %v384_v0, %s630_s11  ;;  %392 = vrot.lane.b32.xlu1 %v391_v1, %s631_s12 }
  0x80   :  { %v20_v6 = vpop.permute.xlu0 %19   ;;  %v33_v7 = vpop.permute.xlu1 %32  }
  0x81   :  { %445 = vst.msk [vmem:[%s909_s1 + $0x16] sm:$0x1] %vm8_vm2, %v20_v6   ;;  %447 = vst.msk [vmem:[%s909_s1 + $0x2c] sm:$0x1] %vm8_vm2, %v33_v7  }
  0x82   :  { %399 = vrot.lane.b32.xlu0 %v398_v4, %s632_s17  ;;  %405 = vrot.lane.b32.xlu1 %v404_v5, %s633_s18 }
  0x84   :  { %v40_v9 = vpop.permute.xlu0 %39   ;;  %v46_v10 = vpop.permute.xlu1 %45  }
  0x85   :  { %448 = vst.msk [vmem:[%s909_s1 + $0x17] sm:$0x1] %vm8_vm2, %v40_v9   ;;  %449 = vst.msk [vmem:[%s909_s1 + $0x2] sm:$0x1] %vm8_vm2, %v46_v10  }
  0x86   :  { %412 = vrot.lane.b32.xlu0 %v411_v8, %s634_s23 }
  0x88   :  { %v53_v11 = vpop.permute.xlu0 %52   ;;  %v60_v12 = vpop.permute.xlu1 %59  }
  0x89   :  { %450 = vst.msk [vmem:[%s909_s1 + $0x2d] sm:$0x1] %vm8_vm2, %v53_v11   ;;  %451 = vst.msk [vmem:[%s909_s1 + $0x18] sm:$0x1] %vm8_vm2, %v60_v12  }
  0x8c   :  { %v66_v13 = vpop.permute.xlu0 %65   ;;  %v73_v14 = vpop.permute.xlu1 %72  }
  0x8d   :  { %452 = vst.msk [vmem:[%s909_s1 + $0x3] sm:$0x1] %vm8_vm2, %v66_v13   ;;  %453 = vst.msk [vmem:[%s909_s1 + $0x2e] sm:$0x1] %vm8_vm2, %v73_v14  }
  0x90   :  { %v80_v15 = vpop.permute.xlu0 %79   ;;  %v86_v16 = vpop.permute.xlu1 %85  }
  0x91   :  { %454 = vst.msk [vmem:[%s909_s1 + $0x19] sm:$0x1] %vm8_vm2, %v80_v15   ;;  %455 = vst.msk [vmem:[%s909_s1 + $0x4] sm:$0x1] %vm8_vm2, %v86_v16  }
  0x94   :  { %v93_v17 = vpop.permute.xlu0 %92   ;;  %v100_v18 = vpop.permute.xlu1 %99  }
  0x95   :  { %456 = vst.msk [vmem:[%s909_s1 + $0x2f] sm:$0x1] %vm8_vm2, %v93_v17   ;;  %457 = vst.msk [vmem:[%s909_s1 + $0x1a] sm:$0x1] %vm8_vm2, %v100_v18  }
  0x98   :  { %v106_v19 = vpop.permute.xlu0 %105   ;;  %v113_v20 = vpop.permute.xlu1 %112  }
  0x99   :  { %458 = vst.msk [vmem:[%s909_s1 + $0x5] sm:$0x1] %vm8_vm2, %v106_v19   ;;  %459 = vst.msk [vmem:[%s909_s1 + $0x30] sm:$0x1] %vm8_vm2, %v113_v20  }
  0x9c   :  { %v120_v21 = vpop.permute.xlu0 %119   ;;  %v126_v22 = vpop.permute.xlu1 %125  }
  0x9d   :  { %460 = vst.msk [vmem:[%s909_s1 + $0x1b] sm:$0x1] %vm8_vm2, %v120_v21   ;;  %461 = vst.msk [vmem:[%s909_s1 + $0x6] sm:$0x1] %vm8_vm2, %v126_v22  }
  0xa0   :  { %v133_v23 = vpop.permute.xlu0 %132   ;;  %v140_v24 = vpop.permute.xlu1 %139  }
  0xa1   :  { %462 = vst.msk [vmem:[%s909_s1 + $0x31] sm:$0x1] %vm8_vm2, %v133_v23   ;;  %463 = vst.msk [vmem:[%s909_s1 + $0x1c] sm:$0x1] %vm8_vm2, %v140_v24  }
  0xa4   :  { %v146_v25 = vpop.permute.xlu0 %145   ;;  %v153_v26 = vpop.permute.xlu1 %152  }
  0xa5   :  { %464 = vst.msk [vmem:[%s909_s1 + $0x7] sm:$0x1] %vm8_vm2, %v146_v25   ;;  %465 = vst.msk [vmem:[%s909_s1 + $0x32] sm:$0x1] %vm8_vm2, %v153_v26  }
  0xa8   :  { %v160_v27 = vpop.permute.xlu0 %159   ;;  %v166_v28 = vpop.permute.xlu1 %165  }
  0xa9   :  { %466 = vst.msk [vmem:[%s909_s1 + $0x1d] sm:$0x1] %vm8_vm2, %v160_v27   ;;  %467 = vst.msk [vmem:[%s909_s1 + $0x8] sm:$0x1] %vm8_vm2, %v166_v28  }
  0xac   :  { %v173_v29 = vpop.permute.xlu0 %172   ;;  %v180_v30 = vpop.permute.xlu1 %179  }
  0xad   :  { %468 = vst.msk [vmem:[%s909_s1 + $0x33] sm:$0x1] %vm8_vm2, %v173_v29   ;;  %469 = vst.msk [vmem:[%s909_s1 + $0x1e] sm:$0x1] %vm8_vm2, %v180_v30  }
  0xb0   :  { %v186_v31 = vpop.permute.xlu0 %185   ;;  %v193_v32 = vpop.permute.xlu1 %192  }
  0xb1   :  { %470 = vst.msk [vmem:[%s909_s1 + $0x9] sm:$0x1] %vm8_vm2, %v186_v31   ;;  %471 = vst.msk [vmem:[%s909_s1 + $0x34] sm:$0x1] %vm8_vm2, %v193_v32  }
  0xb4   :  { %v200_v33 = vpop.permute.xlu0 %199   ;;  %v206_v34 = vpop.permute.xlu1 %205  }
  0xb5   :  { %472 = vst.msk [vmem:[%s909_s1 + $0x1f] sm:$0x1] %vm8_vm2, %v200_v33   ;;  %473 = vst.msk [vmem:[%s909_s1 + $0xa] sm:$0x1] %vm8_vm2, %v206_v34  }
  0xb8   :  { %v213_v35 = vpop.permute.xlu0 %212   ;;  %v220_v36 = vpop.permute.xlu1 %219  }
  0xb9   :  { %474 = vst.msk [vmem:[%s909_s1 + $0x35] sm:$0x1] %vm8_vm2, %v213_v35   ;;  %475 = vst.msk [vmem:[%s909_s1 + $0x20] sm:$0x1] %vm8_vm2, %v220_v36  }
  0xbc   :  { %v226_v37 = vpop.permute.xlu0 %225   ;;  %v233_v38 = vpop.permute.xlu1 %232  }
  0xbd   :  { %476 = vst.msk [vmem:[%s909_s1 + $0xb] sm:$0x1] %vm8_vm2, %v226_v37   ;;  %477 = vst.msk [vmem:[%s909_s1 + $0x36] sm:$0x1] %vm8_vm2, %v233_v38  }
  0xc0   :  { %v424_v39 = vpop.permute.xlu0 %423   ;;  %v437_v40 = vpop.permute.xlu1 %436  }
  0xc1   :  { %505 = vst.msk [vmem:[%s909_s1 + $0x2a] sm:$0x1] %vm425_vm3, %v424_v39  }
  0xc2   :  { %507 = vst.msk [vmem:[%s909_s1 + $0x15] sm:$0x1] %vm438_vm4, %v437_v40  }
  0xc3   :  { %506 = vst.msk [vmem:[%s909_s1 + $0x2a] sm:$0x1] %vm428_vm5, %v424_v39  }
  0xc4   :  { %508 = vst.msk [vmem:[%s909_s1 + $0x15] sm:$0x1] %vm441_vm6, %v437_v40   ;;  %v240_v41 = vpop.permute.xlu0 %239   ;;  %v246_v42 = vpop.permute.xlu1 %245  }
  0xc5   :  { %478 = vst.msk [vmem:[%s909_s1 + $0x21] sm:$0x1] %vm8_vm2, %v240_v41   ;;  %479 = vst.msk [vmem:[%s909_s1 + $0xc] sm:$0x1] %vm8_vm2, %v246_v42  }
  0xc8   :  { %v253_v43 = vpop.permute.xlu0 %252   ;;  %v260_v44 = vpop.permute.xlu1 %259  }
  0xc9   :  { %480 = vst.msk [vmem:[%s909_s1 + $0x37] sm:$0x1] %vm8_vm2, %v253_v43   ;;  %481 = vst.msk [vmem:[%s909_s1 + $0x22] sm:$0x1] %vm8_vm2, %v260_v44  }
  0xcc   :  { %v266_v45 = vpop.permute.xlu0 %265   ;;  %v273_v46 = vpop.permute.xlu1 %272  }
  0xcd   :  { %482 = vst.msk [vmem:[%s909_s1 + $0xd] sm:$0x1] %vm8_vm2, %v266_v45   ;;  %483 = vst.msk [vmem:[%s909_s1 + $0x38] sm:$0x1] %vm8_vm2, %v273_v46  }
  0xd0   :  { %v280_v47 = vpop.permute.xlu0 %279   ;;  %v286_v48 = vpop.permute.xlu1 %285  }
  0xd1   :  { %484 = vst.msk [vmem:[%s909_s1 + $0x23] sm:$0x1] %vm8_vm2, %v280_v47   ;;  %485 = vst.msk [vmem:[%s909_s1 + $0xe] sm:$0x1] %vm8_vm2, %v286_v48  }
  0xd4   :  { %v293_v49 = vpop.permute.xlu0 %292   ;;  %v300_v50 = vpop.permute.xlu1 %299  }
  0xd5   :  { %486 = vst.msk [vmem:[%s909_s1 + $0x39] sm:$0x1] %vm8_vm2, %v293_v49   ;;  %487 = vst.msk [vmem:[%s909_s1 + $0x24] sm:$0x1] %vm8_vm2, %v300_v50  }
  0xd8   :  { %v306_v51 = vpop.permute.xlu0 %305   ;;  %v313_v52 = vpop.permute.xlu1 %312  }
  0xd9   :  { %488 = vst.msk [vmem:[%s909_s1 + $0xf] sm:$0x1] %vm8_vm2, %v306_v51   ;;  %489 = vst.msk [vmem:[%s909_s1 + $0x3a] sm:$0x1] %vm8_vm2, %v313_v52  }
  0xdc   :  { %v320_v53 = vpop.permute.xlu0 %319   ;;  %v326_v54 = vpop.permute.xlu1 %325  }
  0xdd   :  { %490 = vst.msk [vmem:[%s909_s1 + $0x25] sm:$0x1] %vm8_vm2, %v320_v53   ;;  %491 = vst.msk [vmem:[%s909_s1 + $0x10] sm:$0x1] %vm8_vm2, %v326_v54  }
  0xe0   :  { %v333_v55 = vpop.permute.xlu0 %332   ;;  %v340_v56 = vpop.permute.xlu1 %339  }
  0xe1   :  { %492 = vst.msk [vmem:[%s909_s1 + $0x3b] sm:$0x1] %vm8_vm2, %v333_v55   ;;  %493 = vst.msk [vmem:[%s909_s1 + $0x26] sm:$0x1] %vm8_vm2, %v340_v56  }
  0xe4   :  { %v346_v57 = vpop.permute.xlu0 %345   ;;  %v353_v58 = vpop.permute.xlu1 %352  }
  0xe5   :  { %494 = vst.msk [vmem:[%s909_s1 + $0x11] sm:$0x1] %vm8_vm2, %v346_v57   ;;  %495 = vst.msk [vmem:[%s909_s1 + $0x3c] sm:$0x1] %vm8_vm2, %v353_v58  }
  0xe8   :  { %v360_v59 = vpop.permute.xlu0 %359   ;;  %v366_v60 = vpop.permute.xlu1 %365  }
  0xe9   :  { %496 = vst.msk [vmem:[%s909_s1 + $0x27] sm:$0x1] %vm8_vm2, %v360_v59   ;;  %497 = vst.msk [vmem:[%s909_s1 + $0x12] sm:$0x1] %vm8_vm2, %v366_v60  }
  0xec   :  { %v373_v61 = vpop.permute.xlu0 %372   ;;  %v380_v62 = vpop.permute.xlu1 %379  }
  0xed   :  { %498 = vst.msk [vmem:[%s909_s1 + $0x3d] sm:$0x1] %vm8_vm2, %v373_v61   ;;  %499 = vst.msk [vmem:[%s909_s1 + $0x28] sm:$0x1] %vm8_vm2, %v380_v62  }
  0xf0   :  { %v386_v63 = vpop.permute.xlu0 %385   ;;  %v393_v0 = vpop.permute.xlu1 %392  }
  0xf1   :  { %500 = vst.msk [vmem:[%s909_s1 + $0x13] sm:$0x1] %vm8_vm2, %v386_v63   ;;  %501 = vst.msk [vmem:[%s909_s1 + $0x3e] sm:$0x1] %vm8_vm2, %v393_v0  }
  0xf4   :  { %v400_v1 = vpop.permute.xlu0 %399   ;;  %v406_v2 = vpop.permute.xlu1 %405  }
  0xf5   :  { %502 = vst.msk [vmem:[%s909_s1 + $0x29] sm:$0x1] %vm8_vm2, %v400_v1   ;;  %503 = vst.msk [vmem:[%s909_s1 + $0x14] sm:$0x1] %vm8_vm2, %v406_v2  }
  0xf8   :  { %v413_v3 = vpop.permute.xlu0 %412  }
  0xf9   :  { %504 = vst.msk [vmem:[%s909_s1 + $0x3f] sm:$0x1] %vm8_vm2, %v413_v3  }

// kernel: masked_l2_v2.1
= control target key start
LH: loop header
LB: loop body
LE: loop exit
PB: predicated region body
PF: predicated region fallthrough
CT: control target
= control target key end

     0   :  { %v71_v0 = vlaneseq  ;;  %v129_v5 = vmov 0.0   ;;  %s186_s0 = inlined_call_operand.vmem [shape: f32[1,384], index: 0, kind: input, shape index: {}]   ;;  %s187_s1 = inlined_call_operand.vmem [shape: f32[1,384], index: 1, kind: input, shape index: {}]   ;;  %s188_s2 = inlined_call_operand.vmem [shape: f32[1,384], index: 2, kind: input, shape index: {}]   ;;  %s189_s3 = inlined_call_operand.vmem [shape: f32[1,1,384], index: 3, kind: output, shape index: {0}]   ;;  %s190_s4 = inlined_call_operand.vmem [shape: f32[1,1,384], index: 4, kind: output, shape index: {1}]  }
   0x1   :  { %v77_v1 = vld [vmem:[%s186_s0] sm:$0x7] }
   0x2   :  { %v78_v2 = vld [vmem:[%s187_s1] sm:$0x7]  ;;  %vm161_vm0 = vcmp.lt.s32.totalorder %v71_v0, 384 }
   0x3   :  { %v80_v4 = vsub.f32 %v77_v1, %v78_v2  ;;  %75 = vst.msk [vmem:[#allocation2] sm:$0x7] %vm161_vm0, %v129_v5  ;;  %76 = vst.msk [vmem:[#allocation3] sm:$0x7] %vm161_vm0, %v129_v5  ;;  %v79_v6 = vld [vmem:[%s188_s2] sm:$0x7] }
   0x5   :  { %v81_v7 = vmul.f32 %v80_v4, %v80_v4 }
   0x7   :  { %v82_v8 = vmul.f32 %v81_v7, %v79_v6 }
   0xa   :  { %v83_v9 = vld [vmem:[#allocation2] sm:$0x7]  ;;  %v90_v10 = vld [vmem:[#allocation3] sm:$0x7] }
   0xb   :  { %v84_v11 = vadd.f32 %v83_v9, %v82_v8  ;;  %v91_v12 = vadd.f32 %v90_v10, %v79_v6 }
   0xd   :  { %89 = vst.msk [vmem:[#allocation2] sm:$0x7] %vm161_vm0, %v84_v11  ;;  %92 = vst.msk [vmem:[#allocation3] sm:$0x7] %vm161_vm0, %v91_v12 }
  0x14   :  { %v96_v13 = vld [vmem:[#allocation2] sm:$0x7]  ;;  %v99_v14 = vld [vmem:[#allocation3] sm:$0x7] }
  0x15   :  { %98 = vst.msk [vmem:[%s189_s3] sm:$0x7] %vm161_vm0, %v96_v13  ;;  %101 = vst.msk [vmem:[%s190_s4] sm:$0x7] %vm161_vm0, %v99_v14 }

</bundles_post_ra>
